<compile_context>
chip_gen: v5e
topology: v5e:2x2
jax: 0.10.0
libtpu: 0.0.40
codegen_flags: <defaults>
</compile_context>

<pallas_src>
import functools

import jax
import jax.numpy as jnp
from jax.experimental import pallas as pl
from jax.experimental.pallas import tpu as pltpu

_LANE = 128     # vreg lane width
_SUBLANE = 8    # f32 sublane count


def _linear_kernel(x_ref, w_ref, b_ref, o_ref):
    # x_ref: (TN, E) bf16, w_ref: (E, Opad) bf16, b_ref: (1, Opad) f32,
    # o_ref: (TN, Opad) f32.  MXU matmul with f32 accumulation; the bias add
    # is a VPU op that hides under the DMA / MXU time.
    acc = jnp.dot(x_ref[...], w_ref[...], preferred_element_type=jnp.float32)
    o_ref[...] = (acc + b_ref[...]).astype(o_ref.dtype)


def _round_up(x, m):
    return ((x + m - 1) // m) * m


@functools.partial(jax.jit, static_argnames=("max_tile_n",))
def deepwalk_classifier_forward(embeddings, weight, bias, *, max_tile_n=1024):
    """embeddings: [N, E] f32; weight: [E, O] f32; bias: [O] f32 -> [N, O] f32."""
    n, e = embeddings.shape
    o = weight.shape[1]

    # Lane-dense output: pad out_dim to a multiple of 128.
    o_pad = _round_up(o, _LANE)
    # Largest row tile that covers the problem (multiple of 16 so bf16 sublane
    # packing is clean); demo N=32 -> a single 32-row block.
    tile_n = min(max_tile_n, _round_up(n, 2 * _SUBLANE))
    n_pad = _round_up(n, tile_n)

    # One-time padding + bf16 cast in the wrapper (outside the grid loop).
    x = jnp.pad(embeddings.astype(jnp.bfloat16), ((0, n_pad - n), (0, 0)))
    w = jnp.pad(weight.astype(jnp.bfloat16), ((0, 0), (0, o_pad - o)))
    b = jnp.pad(bias.astype(jnp.float32), ((0, o_pad - o),)).reshape(1, o_pad)

    num_tiles = n_pad // tile_n
    cost = pl.CostEstimate(
        flops=2 * n_pad * e * o_pad,
        transcendentals=0,
        bytes_accessed=(x.size * 2 + w.size * 2 + b.size * 4
                        + n_pad * o_pad * 4),
    )

    out = pl.pallas_call(
        _linear_kernel,
        out_shape=jax.ShapeDtypeStruct((n_pad, o_pad), jnp.float32),
        grid_spec=pltpu.PrefetchScalarGridSpec(
            num_scalar_prefetch=0,
            grid=(num_tiles,),
            in_specs=[
                pl.BlockSpec((tile_n, e), lambda i: (i, 0)),   # node row tile
                pl.BlockSpec((e, o_pad), lambda i: (0, 0)),    # full weight, constant block
                pl.BlockSpec((1, o_pad), lambda i: (0, 0)),    # bias, constant block
            ],
            out_specs=pl.BlockSpec((tile_n, o_pad), lambda i: (i, 0)),
        ),
        compiler_params=pltpu.CompilerParams(
            dimension_semantics=("parallel",),
        ),
        cost_estimate=cost,
    )(x, w, b)

    return out[:n, :o]


def reference_forward_f32(embeddings, weight, bias):
    return embeddings @ weight + bias[None, :]


def reference_forward_bf16(embeddings, weight, bias):
    # Same math as the kernel: bf16-rounded inputs, f32 accumulation, f32 bias.
    xe = embeddings.astype(jnp.bfloat16).astype(jnp.float32)
    we = weight.astype(jnp.bfloat16).astype(jnp.float32)
    return xe @ we + bias[None, :]


if __name__ == "__main__":
    # Small shapes consistent with the module: num_nodes graph nodes,
    # embed_size=128 (Word2Vec default in DeepWalk.fit), out_dim=16 classes.
    num_nodes = 32
    embed_size = 128
    out_dim = 16

    key = jax.random.PRNGKey(0)
    k_emb, k_w, k_b = jax.random.split(key, 3)

    # Deterministic stand-in for DeepWalk/Word2Vec node embeddings.
    embeddings = jax.random.normal(k_emb, (num_nodes, embed_size), dtype=jnp.float32)

    # nn.Linear(embed_size, out_dim): weight [out_dim, embed_size], bias [out_dim].
    # Stored here pre-transposed to [embed_size, out_dim] for the kernel layout.
    bound = 1.0 / (embed_size ** 0.5)
    weight = jax.random.uniform(
        k_w, (embed_size, out_dim), minval=-bound, maxval=bound, dtype=jnp.float32
    )
    bias = jax.random.uniform(
        k_b, (out_dim,), minval=-bound, maxval=bound, dtype=jnp.float32
    )

    out = deepwalk_classifier_forward(embeddings, weight, bias)
    out = jax.block_until_ready(out)

    assert out.shape == (num_nodes, out_dim)

    # Tight check vs a reference with the same bf16 input rounding / f32 accum.
    ref_bf16 = reference_forward_bf16(embeddings, weight, bias)
    assert jnp.allclose(out, ref_bf16, atol=1e-3, rtol=1e-3), \
        "mismatch vs bf16-input reference"

    # Loose check vs the full-f32 nn.Linear semantics (bf16 quantization noise only).
    ref_f32 = reference_forward_f32(embeddings, weight, bias)
    assert jnp.allclose(out, ref_f32, atol=5e-2, rtol=5e-2), \
        "mismatch vs f32 reference"

    print("KERNEL_OK")
</pallas_src>

<mosaic_0001>
module attributes {stable_mosaic.version = 11 : i64} {
  func.func @_linear_kernel(%arg0: i32, %arg1: memref<32x128xbf16, #tpu.memory_space<vmem>>, %arg2: memref<128x128xbf16, #tpu.memory_space<vmem>>, %arg3: memref<1x128xf32, #tpu.memory_space<vmem>>, %arg4: memref<32x128xf32, #tpu.memory_space<vmem>>) attributes {dimension_semantics = [#tpu.dimension_semantics<parallel>], iteration_bounds = array<i64: 1>, scalar_prefetch = 0 : i64, scratch_operands = 0 : i64, tpu.core_type = #tpu.core_type<tc>, window_params = [{transform_indices = @transform_0, window_bounds = array<i64: 32, 128>}, {pipeline_mode = #tpu.pipeline_mode<synchronous>, transform_indices = @transform_1, window_bounds = array<i64: 128, 128>}, {pipeline_mode = #tpu.pipeline_mode<synchronous>, transform_indices = @transform_2, window_bounds = array<i64: 1, 128>}, {transform_indices = @transform_3, window_bounds = array<i64: 32, 128>}]} {
    %c0 = arith.constant 0 : index
    %c0_0 = arith.constant 0 : index
    %0 = vector.load %arg1[%c0, %c0_0] : memref<32x128xbf16, #tpu.memory_space<vmem>>, vector<32x128xbf16>
    %c0_1 = arith.constant 0 : index
    %c0_2 = arith.constant 0 : index
    %1 = vector.load %arg2[%c0_1, %c0_2] : memref<128x128xbf16, #tpu.memory_space<vmem>>, vector<128x128xbf16>
    %cst = arith.constant dense<0.000000e+00> : vector<32x128xf32>
    %2 = tpu.matmul %0, %1, %cst {dimension_numbers = #tpu.dot_dimension_numbers<[1], [0], [0], [1], [0, 0, 1, 1], [], []>} : vector<32x128xbf16>, vector<128x128xbf16>, vector<32x128xf32> -> vector<32x128xf32>
    %c0_3 = arith.constant 0 : index
    %c0_4 = arith.constant 0 : index
    %3 = vector.load %arg3[%c0_3, %c0_4] : memref<1x128xf32, #tpu.memory_space<vmem>>, vector<1x128xf32>
    %4 = vector.broadcast %3 : vector<1x128xf32> to vector<32x128xf32>
    %5 = arith.addf %2, %4 : vector<32x128xf32>
    %c0_5 = arith.constant 0 : index
    %c0_6 = arith.constant 0 : index
    %6 = vector.load %arg4[%c0_5, %c0_6] : memref<32x128xf32, #tpu.memory_space<vmem>>, vector<32x128xf32>
    tpu.vector_store %arg4[%c0_5, %c0_6], %5 {strides = array<i32>} : memref<32x128xf32, #tpu.memory_space<vmem>>, vector<32x128xf32>,
    return
  }
  func.func @transform_0(%arg0: i32) -> (i32, i32) {
    %c0_i32 = arith.constant 0 : i32
    %c0_i32_0 = arith.constant 0 : i32
    return %arg0, %c0_i32 : i32, i32
  }
  func.func @transform_1(%arg0: i32) -> (i32, i32) {
    %c0_i32 = arith.constant 0 : i32
    %c0_i32_0 = arith.constant 0 : i32
    %c0_i32_1 = arith.constant 0 : i32
    return %c0_i32, %c0_i32_0 : i32, i32
  }
  func.func @transform_2(%arg0: i32) -> (i32, i32) {
    %c0_i32 = arith.constant 0 : i32
    %c0_i32_0 = arith.constant 0 : i32
    %c0_i32_1 = arith.constant 0 : i32
    return %c0_i32, %c0_i32_0 : i32, i32
  }
  func.func @transform_3(%arg0: i32) -> (i32, i32) {
    %c0_i32 = arith.constant 0 : i32
    %c0_i32_0 = arith.constant 0 : i32
    return %arg0, %c0_i32 : i32, i32
  }
}

</mosaic_0001>

<bundles_post_ra>
// kernel: deepwalk_classifier_forward.1
= control target key start
LH: loop header
LB: loop body
LE: loop exit
PB: predicated region body
PF: predicated region fallthrough
CT: control target
= control target key end

     0   :  { %s249_s1 = inlined_call_operand.vmem [shape: bf16[128,128], index: 1, kind: input, shape index: {}]   ;;  %s250_s2 = inlined_call_operand.vmem [shape: f32[1,128], index: 2, kind: input, shape index: {}]   ;;  %s251_s0 = inlined_call_operand.vmem [shape: bf16[32,128], index: 0, kind: input, shape index: {}]   ;;  %s252_s3 = inlined_call_operand.vmem [shape: f32[32,128], index: 3, kind: output, shape index: {}]  }
   0x1   :  { %v174_v0 = vld [vmem:[%s249_s1 + $0x38] sm:$0xff]  ;;  %v173_v1 = vld [vmem:[%s249_s1 + $0x30] sm:$0xff]  ;;  %v172_v2 = vld [vmem:[%s249_s1 + $0x28] sm:$0xff] }
   0x2   :  { %98 = vmatpush.bf16.msra.mxu0 %v174_v0  ;;  %175 = vmatpush.bf16.msra.mxu1 %v174_v0  ;;  %v171_v3 = vld [vmem:[%s249_s1 + $0x20] sm:$0xff]  ;;  %v170_v4 = vld [vmem:[%s249_s1 + $0x18] sm:$0xff]  ;;  %v169_v5 = vld [vmem:[%s249_s1 + $0x10] sm:$0xff] }
   0x3   :  { %v168_v6 = vld [vmem:[%s249_s1 + $0x8] sm:$0xff]  ;;  %v167_v7 = vld [vmem:[%s249_s1] sm:$0xff] }
   0x4   :  { %v165_v8 = vld [vmem:[%s251_s0] sm:$0xff]  ;;  %v166_v9 = vld [vmem:[%s251_s0 + $0x8] sm:$0xff] }
   0x5   :  { %v183_v10 = vld [vmem:[%s250_s2] ss:$0 sm:$0xff] }
   0x6   :  { %99 = vmatpush.bf16.msra.mxu0 %v173_v1  ;;  %176 = vmatpush.bf16.msra.mxu1 %v173_v1 }
   0xa   :  { %100 = vmatpush.bf16.msra.mxu0 %v172_v2  ;;  %177 = vmatpush.bf16.msra.mxu1 %v172_v2 }
   0xe   :  { %101 = vmatpush.bf16.msra.mxu0 %v171_v3  ;;  %178 = vmatpush.bf16.msra.mxu1 %v171_v3 }
  0x12   :  { %102 = vmatpush.bf16.msra.mxu0 %v170_v4  ;;  %179 = vmatpush.bf16.msra.mxu1 %v170_v4 }
  0x16   :  { %103 = vmatpush.bf16.msra.mxu0 %v169_v5  ;;  %180 = vmatpush.bf16.msra.mxu1 %v169_v5 }
  0x1a   :  { %104 = vmatpush.bf16.msra.mxu0 %v168_v6  ;;  %181 = vmatpush.bf16.msra.mxu1 %v168_v6 }
  0x1e   :  { %105 = vmatpush.bf16.msra.mxu0 %v167_v7  ;;  %182 = vmatpush.bf16.msra.mxu1 %v167_v7 }
  0x21   :  { %106 = vmatmul.bf16.vlgmr.msra.gmra.mxu0 %v165_v8  ;;  %111 = vmatmul.bf16.vlgmr.msra.gmra.mxu1 %v166_v9 }
  0x9e   :  { %v107_v11 = vpop.f32.mrf.mxu0  ;;  %v112_v12 = vpop.f32.mrf.mxu1 }
  0x9f   :  { %v108_v13 = vadd.f32 %v183_v10, %v107_v11  ;;  %v113_v14 = vadd.f32 %v183_v10, %v112_v12 }
  0xa1   :  { %117 = vst [vmem:[%s252_s3] sm:$0xff] %v108_v13 }
  0xa2   :  { %119 = vst [vmem:[%s252_s3 + $0x10] sm:$0xff] %v113_v14 }
  0xa6   :  { %v109_v15 = vpop.f32.mrf.mxu0  ;;  %v114_v16 = vpop.f32.mrf.mxu1 }
  0xa7   :  { %v110_v17 = vadd.f32 %v183_v10, %v109_v15  ;;  %v115_v18 = vadd.f32 %v183_v10, %v114_v16 }
  0xa9   :  { %118 = vst [vmem:[%s252_s3 + $0x8] sm:$0xff] %v110_v17 }
  0xaa   :  { %120 = vst [vmem:[%s252_s3 + $0x18] sm:$0xff] %v115_v18 }

</bundles_post_ra>
